<compile_context>
chip_gen: v7x
topology: tpu7x:2x2x1
jax: 0.10.0
libtpu: 0.0.40
codegen_flags: <defaults>
</compile_context>

<pallas_src>
import jax
import jax.numpy as jnp
from jax import lax
from jax.experimental import pallas as pl
from jax.experimental.pallas import tpu as pltpu


def regular_bottleneck(x_nchw, params):
    """x_nchw: (N, C, H, W) float32 (PyTorch layout). Returns (N, C, H, W) bf16."""
    w1, b1, w2, b2, w3, b3 = params
    N, C, H, W = x_nchw.shape
    Cint = w1.shape[0]
    HW = H * W
    L = N * HW                     # all images concatenated along the lane axis

    def kernel(x_ref, w1_ref, b1_ref, w2_ref, b2_ref, w3_ref, b3_ref,
               m_ref, o_ref):
        x = x_ref[...]                                        # (C, L) bf16

        # ext_conv1: 1x1 projection (BN scale folded into w1) + shift + ReLU.
        h1 = jnp.dot(w1_ref[...], x, preferred_element_type=jnp.float32)
        h1 = jnp.maximum(h1 + b1_ref[...], 0.0)               # (Cint, L) f32

        # 3x3 im2col kept register-resident: tap (dh,dw) at flat pixel p is
        # h1[p + dh*W + dw] -> a lane roll by -(dh*W+dw), zeroed by the
        # precomputed boundary mask wherever (r+dh, c+dw) leaves its image
        # (this also kills cross-image / wrap-around contamination).
        taps = []
        t = 0
        for dh in (-1, 0, 1):
            for dw in (-1, 0, 1):
                off = dh * W + dw
                tap = h1 if off == 0 else pltpu.roll(h1, shift=(-off) % L, axis=1)
                if t != 4:                         # center tap needs no mask
                    tap = tap * m_ref[pl.ds(t, 1), :]   # mask in f32, pre-cast
                taps.append(tap)
                t += 1
        im2col = jnp.concatenate(taps, axis=0).astype(jnp.bfloat16)  # (9*Cint, L)

        # ext_conv2: 3x3 conv as ONE matmul with K = 9*Cint, + shift + ReLU.
        h2 = jnp.dot(w2_ref[...], im2col, preferred_element_type=jnp.float32)
        h2 = jnp.maximum(h2 + b2_ref[...], 0.0)               # (Cint, L) f32

        # ext_conv3: 1x1 expansion + shift + ReLU.
        h3 = jnp.dot(w3_ref[...], h2.astype(jnp.bfloat16),
                     preferred_element_type=jnp.float32)
        h3 = jnp.maximum(h3 + b3_ref[...], 0.0)               # (C, L) f32

        # ext_regul: Dropout2d(p=0) == identity.  Residual add + output ReLU.
        # Re-read x here rather than keeping it live across the matmuls.
        x_res = x_ref[...].astype(jnp.float32)
        o_ref[...] = jnp.maximum(x_res + h3, 0.0).astype(o_ref.dtype)

    # Precomputed per-lane 0/1 masks for the 9 taps (row-major over dh, dw):
    # tap t is valid iff the source pixel stays inside its own image.
    p = jnp.arange(L, dtype=jnp.int32)
    r = (p % HW) // W
    c = p % W
    masks = []
    for dh in (-1, 0, 1):
        for dw in (-1, 0, 1):
            ok = jnp.ones((L,), bool)
            if dh == -1:
                ok &= r >= 1
            elif dh == 1:
                ok &= r <= H - 2
            if dw == -1:
                ok &= c >= 1
            elif dw == 1:
                ok &= c <= W - 2
            masks.append(ok)
    tap_masks = jnp.stack(masks).astype(jnp.float32)          # (9, L)

    cost = pl.CostEstimate(
        flops=2 * L * (C * Cint + 9 * Cint * Cint + Cint * C),
        transcendentals=0,
        bytes_accessed=2 * C * L * 2                # bf16 x in + bf16 out
        + int(tap_masks.size) * 4
        + sum(int(q.size) * q.dtype.itemsize for q in params),
    )

    # Channels-first with the whole batch on the lane axis; bf16 I/O halves
    # the dominant HBM traffic for this bandwidth-bound op.
    x_cf = jnp.transpose(x_nchw, (1, 0, 2, 3)).reshape(C, L).astype(jnp.bfloat16)

    out_cf = pl.pallas_call(
        kernel,
        out_shape=jax.ShapeDtypeStruct((C, L), jnp.bfloat16),
        grid_spec=pltpu.PrefetchScalarGridSpec(
            num_scalar_prefetch=0,
            grid=(1,),
            in_specs=[
                pl.BlockSpec((C, L), lambda i: (0, 0)),            # x (bf16)
                pl.BlockSpec((Cint, C), lambda i: (0, 0)),         # w1 (bf16)
                pl.BlockSpec((Cint, 1), lambda i: (0, 0)),         # b1
                pl.BlockSpec((Cint, 9 * Cint), lambda i: (0, 0)),  # w2 (bf16)
                pl.BlockSpec((Cint, 1), lambda i: (0, 0)),         # b2
                pl.BlockSpec((C, Cint), lambda i: (0, 0)),         # w3 (bf16)
                pl.BlockSpec((C, 1), lambda i: (0, 0)),            # b3
                pl.BlockSpec((9, L), lambda i: (0, 0)),            # tap masks
            ],
            out_specs=pl.BlockSpec((C, L), lambda i: (0, 0)),
        ),
        compiler_params=pltpu.CompilerParams(
            dimension_semantics=("arbitrary",),
            vmem_limit_bytes=32 * 1024 * 1024,
        ),
        cost_estimate=cost,
    )(x_cf, w1, b1, w2, b2, w3, b3, tap_masks)

    return jnp.transpose(out_cf.reshape(C, N, H, W), (1, 0, 2, 3))


def reference_nchw(x, ref_params):
    """Pure-JAX f32 reference (same math as the PyTorch module in eval mode),
    using the same (bf16-rounded) folded weights the kernel consumes."""
    w1, b1, w2, b2, w3, b3 = ref_params

    def conv(h, w, pad):
        return lax.conv_general_dilated(
            h, w, (1, 1), pad, dimension_numbers=('NCHW', 'OIHW', 'NCHW'))

    h = jax.nn.relu(conv(x, w1, 'VALID') + b1.reshape(1, -1, 1, 1))
    h = jax.nn.relu(conv(h, w2, [(1, 1), (1, 1)]) + b2.reshape(1, -1, 1, 1))
    h = jax.nn.relu(conv(h, w3, 'VALID') + b3.reshape(1, -1, 1, 1))
    return jax.nn.relu(x + h)


def make_params(key, channels, internal_ratio=4, eps=1e-5):
    """Builds (kernel_params, reference_params) with BN(eval) scale folded
    into the conv weights; matmul weights are bf16, shifts stay f32."""
    cint = channels // internal_ratio
    ks = jax.random.split(key, 15)

    def bn_fold(kg, kb, km, kv, c):
        gamma = jax.random.uniform(kg, (c,), jnp.float32, 0.5, 1.5)
        beta = 0.1 * jax.random.normal(kb, (c,), jnp.float32)
        mean = 0.1 * jax.random.normal(km, (c,), jnp.float32)
        var = jax.random.uniform(kv, (c,), jnp.float32, 0.5, 1.5)
        scale = gamma / jnp.sqrt(var + eps)
        shift = beta - mean * scale
        return scale, shift

    # Conv weights in PyTorch OIHW layout (bias=False in the module).
    w1_oihw = 0.3 * jax.random.normal(ks[0], (cint, channels, 1, 1), jnp.float32)
    w2_oihw = 0.3 * jax.random.normal(ks[1], (cint, cint, 3, 3), jnp.float32)
    w3_oihw = 0.3 * jax.random.normal(ks[2], (channels, cint, 1, 1), jnp.float32)

    s1, sh1 = bn_fold(ks[3], ks[4], ks[5], ks[6], cint)
    s2, sh2 = bn_fold(ks[7], ks[8], ks[9], ks[10], cint)
    s3, sh3 = bn_fold(ks[11], ks[12], ks[13], ks[14], channels)

    # Fold BN scale into the conv weights (offline), cast to bf16 for the MXU.
    w1_f = s1[:, None] * w1_oihw[:, :, 0, 0]                   # (cint, C)
    w2_f = s2[:, None, None, None] * w2_oihw                   # (cint, cint, 3, 3)
    w3_f = s3[:, None] * w3_oihw[:, :, 0, 0]                   # (C, cint)

    w1_k = w1_f.astype(jnp.bfloat16)
    w2_k = jnp.transpose(w2_f, (0, 2, 3, 1)).reshape(
        cint, 9 * cint).astype(jnp.bfloat16)                   # [o, (kh*3+kw)*cint+i]
    w3_k = w3_f.astype(jnp.bfloat16)

    kernel_params = (w1_k, sh1.reshape(cint, 1), w2_k, sh2.reshape(cint, 1),
                     w3_k, sh3.reshape(channels, 1))

    # f32 reference weights in OIHW derived from the SAME bf16 values, so the
    # reference and the kernel share identical weights (only activation
    # rounding differs).
    w1_r = w1_k.astype(jnp.float32)[:, :, None, None]
    w2_r = jnp.transpose(
        w2_k.astype(jnp.float32).reshape(cint, 3, 3, cint), (0, 3, 1, 2))
    w3_r = w3_k.astype(jnp.float32)[:, :, None, None]
    ref_params = (w1_r, sh1, w2_r, sh2, w3_r, sh3)

    return kernel_params, ref_params


if __name__ == "__main__":
    # Small shapes: batch=2, channels=8 (internal_ratio=4 -> internal=2), 16x16.
    N, C, H, W = 2, 8, 16, 16
    key = jax.random.PRNGKey(0)
    kx, kp = jax.random.split(key)

    x_nchw = jax.random.normal(kx, (N, C, H, W), jnp.float32)   # PyTorch layout
    kernel_params, ref_params = make_params(kp, C, internal_ratio=4)

    out = regular_bottleneck(x_nchw, kernel_params)
    out = jax.block_until_ready(out)

    # Reference consumes the same bf16-rounded x and weights the kernel sees,
    # so only in-kernel activation / bf16-output rounding differs.
    x_used = x_nchw.astype(jnp.bfloat16).astype(jnp.float32)
    ref = reference_nchw(x_used, ref_params)
    assert out.shape == (N, C, H, W)
    assert jnp.allclose(out.astype(jnp.float32), ref, atol=5e-2, rtol=5e-2), \
        "mismatch vs reference"

    print("KERNEL_OK")
</pallas_src>

<mosaic_0001>
module attributes {stable_mosaic.version = 11 : i64} {
  func.func @kernel(%arg0: i32, %arg1: memref<8x512xbf16, #tpu.memory_space<vmem>>, %arg2: memref<2x8xbf16, #tpu.memory_space<vmem>>, %arg3: memref<2x1xf32, #tpu.memory_space<vmem>>, %arg4: memref<2x18xbf16, #tpu.memory_space<vmem>>, %arg5: memref<2x1xf32, #tpu.memory_space<vmem>>, %arg6: memref<8x2xbf16, #tpu.memory_space<vmem>>, %arg7: memref<8x1xf32, #tpu.memory_space<vmem>>, %arg8: memref<9x512xf32, #tpu.memory_space<vmem>>, %arg9: memref<8x512xbf16, #tpu.memory_space<vmem>>) attributes {dimension_semantics = [#tpu.dimension_semantics<arbitrary>], iteration_bounds = array<i64: 1>, scalar_prefetch = 0 : i64, scratch_operands = 0 : i64, tpu.core_type = #tpu.core_type<tc>, window_params = [{pipeline_mode = #tpu.pipeline_mode<synchronous>, transform_indices = @transform_0, window_bounds = array<i64: 8, 512>}, {pipeline_mode = #tpu.pipeline_mode<synchronous>, transform_indices = @transform_1, window_bounds = array<i64: 2, 8>}, {pipeline_mode = #tpu.pipeline_mode<synchronous>, transform_indices = @transform_2, window_bounds = array<i64: 2, 1>}, {pipeline_mode = #tpu.pipeline_mode<synchronous>, transform_indices = @transform_3, window_bounds = array<i64: 2, 18>}, {pipeline_mode = #tpu.pipeline_mode<synchronous>, transform_indices = @transform_4, window_bounds = array<i64: 2, 1>}, {pipeline_mode = #tpu.pipeline_mode<synchronous>, transform_indices = @transform_5, window_bounds = array<i64: 8, 2>}, {pipeline_mode = #tpu.pipeline_mode<synchronous>, transform_indices = @transform_6, window_bounds = array<i64: 8, 1>}, {pipeline_mode = #tpu.pipeline_mode<synchronous>, transform_indices = @transform_7, window_bounds = array<i64: 9, 512>}, {pipeline_mode = #tpu.pipeline_mode<synchronous>, transform_indices = @transform_8, window_bounds = array<i64: 8, 512>}]} {
    %c0 = arith.constant 0 : index
    %c0_0 = arith.constant 0 : index
    %0 = vector.load %arg1[%c0, %c0_0] : memref<8x512xbf16, #tpu.memory_space<vmem>>, vector<8x512xbf16>
    %c0_1 = arith.constant 0 : index
    %c0_2 = arith.constant 0 : index
    %1 = vector.load %arg2[%c0_1, %c0_2] : memref<2x8xbf16, #tpu.memory_space<vmem>>, vector<2x8xbf16>
    %cst = arith.constant dense<0.000000e+00> : vector<2x512xf32>
    %2 = tpu.matmul %1, %0, %cst {dimension_numbers = #tpu.dot_dimension_numbers<[1], [0], [0], [1], [0, 0, 1, 1], [], []>} : vector<2x8xbf16>, vector<8x512xbf16>, vector<2x512xf32> -> vector<2x512xf32>
    %c0_3 = arith.constant 0 : index
    %c0_4 = arith.constant 0 : index
    %3 = vector.load %arg3[%c0_3, %c0_4] : memref<2x1xf32, #tpu.memory_space<vmem>>, vector<2x1xf32>
    %4 = vector.broadcast %3 : vector<2x1xf32> to vector<2x512xf32>
    %5 = arith.addf %2, %4 : vector<2x512xf32>
    %cst_5 = arith.constant 0.000000e+00 : f32
    %6 = vector.broadcast %cst_5 : f32 to vector<2x512xf32>
    %7 = arith.maximumf %5, %6 : vector<2x512xf32>
    %c17_i32 = arith.constant 17 : i32
    %8 = tpu.dynamic_rotate %7 by %c17_i32 dim 1 : vector<2x512xf32>, i32 -> vector<2x512xf32>
    %c0_6 = arith.constant 0 : index
    %c0_7 = arith.constant 0 : index
    %9 = vector.load %arg8[%c0_6, %c0_7] : memref<9x512xf32, #tpu.memory_space<vmem>>, vector<1x512xf32>
    %10 = vector.broadcast %9 : vector<1x512xf32> to vector<2x512xf32>
    %11 = arith.mulf %8, %10 : vector<2x512xf32>
    %c16_i32 = arith.constant 16 : i32
    %12 = tpu.dynamic_rotate %7 by %c16_i32 dim 1 : vector<2x512xf32>, i32 -> vector<2x512xf32>
    %c1 = arith.constant 1 : index
    %c0_8 = arith.constant 0 : index
    %13 = vector.load %arg8[%c1, %c0_8] : memref<9x512xf32, #tpu.memory_space<vmem>>, vector<1x512xf32>
    %14 = vector.broadcast %13 : vector<1x512xf32> to vector<2x512xf32>
    %15 = arith.mulf %12, %14 : vector<2x512xf32>
    %c15_i32 = arith.constant 15 : i32
    %16 = tpu.dynamic_rotate %7 by %c15_i32 dim 1 : vector<2x512xf32>, i32 -> vector<2x512xf32>
    %c2 = arith.constant 2 : index
    %c0_9 = arith.constant 0 : index
    %17 = vector.load %arg8[%c2, %c0_9] : memref<9x512xf32, #tpu.memory_space<vmem>>, vector<1x512xf32>
    %18 = vector.broadcast %17 : vector<1x512xf32> to vector<2x512xf32>
    %19 = arith.mulf %16, %18 : vector<2x512xf32>
    %c1_i32 = arith.constant 1 : i32
    %20 = tpu.dynamic_rotate %7 by %c1_i32 dim 1 : vector<2x512xf32>, i32 -> vector<2x512xf32>
    %c3 = arith.constant 3 : index
    %c0_10 = arith.constant 0 : index
    %21 = vector.load %arg8[%c3, %c0_10] : memref<9x512xf32, #tpu.memory_space<vmem>>, vector<1x512xf32>
    %22 = vector.broadcast %21 : vector<1x512xf32> to vector<2x512xf32>
    %23 = arith.mulf %20, %22 : vector<2x512xf32>
    %c511_i32 = arith.constant 511 : i32
    %24 = tpu.dynamic_rotate %7 by %c511_i32 dim 1 : vector<2x512xf32>, i32 -> vector<2x512xf32>
    %c5 = arith.constant 5 : index
    %c0_11 = arith.constant 0 : index
    %25 = vector.load %arg8[%c5, %c0_11] : memref<9x512xf32, #tpu.memory_space<vmem>>, vector<1x512xf32>
    %26 = vector.broadcast %25 : vector<1x512xf32> to vector<2x512xf32>
    %27 = arith.mulf %24, %26 : vector<2x512xf32>
    %c497_i32 = arith.constant 497 : i32
    %28 = tpu.dynamic_rotate %7 by %c497_i32 dim 1 : vector<2x512xf32>, i32 -> vector<2x512xf32>
    %c6 = arith.constant 6 : index
    %c0_12 = arith.constant 0 : index
    %29 = vector.load %arg8[%c6, %c0_12] : memref<9x512xf32, #tpu.memory_space<vmem>>, vector<1x512xf32>
    %30 = vector.broadcast %29 : vector<1x512xf32> to vector<2x512xf32>
    %31 = arith.mulf %28, %30 : vector<2x512xf32>
    %c496_i32 = arith.constant 496 : i32
    %32 = tpu.dynamic_rotate %7 by %c496_i32 dim 1 : vector<2x512xf32>, i32 -> vector<2x512xf32>
    %c7 = arith.constant 7 : index
    %c0_13 = arith.constant 0 : index
    %33 = vector.load %arg8[%c7, %c0_13] : memref<9x512xf32, #tpu.memory_space<vmem>>, vector<1x512xf32>
    %34 = vector.broadcast %33 : vector<1x512xf32> to vector<2x512xf32>
    %35 = arith.mulf %32, %34 : vector<2x512xf32>
    %c495_i32 = arith.constant 495 : i32
    %36 = tpu.dynamic_rotate %7 by %c495_i32 dim 1 : vector<2x512xf32>, i32 -> vector<2x512xf32>
    %c8 = arith.constant 8 : index
    %c0_14 = arith.constant 0 : index
    %37 = vector.load %arg8[%c8, %c0_14] : memref<9x512xf32, #tpu.memory_space<vmem>>, vector<1x512xf32>
    %38 = vector.broadcast %37 : vector<1x512xf32> to vector<2x512xf32>
    %39 = arith.mulf %36, %38 : vector<2x512xf32>
    %40 = tpu.concatenate %11, %15, %19, %23, %7, %27, %31, %35, %39 in 0 : vector<2x512xf32>, vector<2x512xf32>, vector<2x512xf32>, vector<2x512xf32>, vector<2x512xf32>, vector<2x512xf32>, vector<2x512xf32>, vector<2x512xf32>, vector<2x512xf32> -> vector<18x512xf32>
    %41 = arith.truncf %40 : vector<18x512xf32> to vector<18x512xbf16>
    %c0_15 = arith.constant 0 : index
    %c0_16 = arith.constant 0 : index
    %42 = vector.load %arg4[%c0_15, %c0_16] : memref<2x18xbf16, #tpu.memory_space<vmem>>, vector<2x18xbf16>
    %cst_17 = arith.constant dense<0.000000e+00> : vector<2x512xf32>
    %43 = tpu.matmul %42, %41, %cst_17 {dimension_numbers = #tpu.dot_dimension_numbers<[1], [0], [0], [1], [0, 0, 1, 1], [], []>} : vector<2x18xbf16>, vector<18x512xbf16>, vector<2x512xf32> -> vector<2x512xf32>
    %c0_18 = arith.constant 0 : index
    %c0_19 = arith.constant 0 : index
    %44 = vector.load %arg5[%c0_18, %c0_19] : memref<2x1xf32, #tpu.memory_space<vmem>>, vector<2x1xf32>
    %45 = vector.broadcast %44 : vector<2x1xf32> to vector<2x512xf32>
    %46 = arith.addf %43, %45 : vector<2x512xf32>
    %cst_20 = arith.constant 0.000000e+00 : f32
    %47 = vector.broadcast %cst_20 : f32 to vector<2x512xf32>
    %48 = arith.maximumf %46, %47 : vector<2x512xf32>
    %c0_21 = arith.constant 0 : index
    %c0_22 = arith.constant 0 : index
    %49 = vector.load %arg6[%c0_21, %c0_22] : memref<8x2xbf16, #tpu.memory_space<vmem>>, vector<8x2xbf16>
    %50 = arith.truncf %48 : vector<2x512xf32> to vector<2x512xbf16>
    %cst_23 = arith.constant dense<0.000000e+00> : vector<8x512xf32>
    %51 = tpu.matmul %49, %50, %cst_23 {dimension_numbers = #tpu.dot_dimension_numbers<[1], [0], [0], [1], [0, 0, 1, 1], [], []>} : vector<8x2xbf16>, vector<2x512xbf16>, vector<8x512xf32> -> vector<8x512xf32>
    %c0_24 = arith.constant 0 : index
    %c0_25 = arith.constant 0 : index
    %52 = vector.load %arg7[%c0_24, %c0_25] : memref<8x1xf32, #tpu.memory_space<vmem>>, vector<8x1xf32>
    %53 = vector.broadcast %52 : vector<8x1xf32> to vector<8x512xf32>
    %54 = arith.addf %51, %53 : vector<8x512xf32>
    %cst_26 = arith.constant 0.000000e+00 : f32
    %55 = vector.broadcast %cst_26 : f32 to vector<8x512xf32>
    %56 = arith.maximumf %54, %55 : vector<8x512xf32>
    %c0_27 = arith.constant 0 : index
    %c0_28 = arith.constant 0 : index
    %57 = vector.load %arg1[%c0_27, %c0_28] : memref<8x512xbf16, #tpu.memory_space<vmem>>, vector<8x512xbf16>
    %58 = arith.extf %57 : vector<8x512xbf16> to vector<8x512xf32>
    %59 = arith.addf %58, %56 : vector<8x512xf32>
    %cst_29 = arith.constant 0.000000e+00 : f32
    %60 = vector.broadcast %cst_29 : f32 to vector<8x512xf32>
    %61 = arith.maximumf %59, %60 : vector<8x512xf32>
    %62 = arith.truncf %61 : vector<8x512xf32> to vector<8x512xbf16>
    %c0_30 = arith.constant 0 : index
    %c0_31 = arith.constant 0 : index
    %63 = vector.load %arg9[%c0_30, %c0_31] : memref<8x512xbf16, #tpu.memory_space<vmem>>, vector<8x512xbf16>
    tpu.vector_store %arg9[%c0_30, %c0_31], %62 {strides = array<i32>} : memref<8x512xbf16, #tpu.memory_space<vmem>>, vector<8x512xbf16>,
    return
  }
  func.func @transform_0(%arg0: i32) -> (i32, i32) {
    %c0_i32 = arith.constant 0 : i32
    %c0_i32_0 = arith.constant 0 : i32
    %c0_i32_1 = arith.constant 0 : i32
    return %c0_i32, %c0_i32_0 : i32, i32
  }
  func.func @transform_1(%arg0: i32) -> (i32, i32) {
    %c0_i32 = arith.constant 0 : i32
    %c0_i32_0 = arith.constant 0 : i32
    %c0_i32_1 = arith.constant 0 : i32
    return %c0_i32, %c0_i32_0 : i32, i32
  }
  func.func @transform_2(%arg0: i32) -> (i32, i32) {
    %c0_i32 = arith.constant 0 : i32
    %c0_i32_0 = arith.constant 0 : i32
    %c0_i32_1 = arith.constant 0 : i32
    return %c0_i32, %c0_i32_0 : i32, i32
  }
  func.func @transform_3(%arg0: i32) -> (i32, i32) {
    %c0_i32 = arith.constant 0 : i32
    %c0_i32_0 = arith.constant 0 : i32
    %c0_i32_1 = arith.constant 0 : i32
    return %c0_i32, %c0_i32_0 : i32, i32
  }
  func.func @transform_4(%arg0: i32) -> (i32, i32) {
    %c0_i32 = arith.constant 0 : i32
    %c0_i32_0 = arith.constant 0 : i32
    %c0_i32_1 = arith.constant 0 : i32
    return %c0_i32, %c0_i32_0 : i32, i32
  }
  func.func @transform_5(%arg0: i32) -> (i32, i32) {
    %c0_i32 = arith.constant 0 : i32
    %c0_i32_0 = arith.constant 0 : i32
    %c0_i32_1 = arith.constant 0 : i32
    return %c0_i32, %c0_i32_0 : i32, i32
  }
  func.func @transform_6(%arg0: i32) -> (i32, i32) {
    %c0_i32 = arith.constant 0 : i32
    %c0_i32_0 = arith.constant 0 : i32
    %c0_i32_1 = arith.constant 0 : i32
    return %c0_i32, %c0_i32_0 : i32, i32
  }
  func.func @transform_7(%arg0: i32) -> (i32, i32) {
    %c0_i32 = arith.constant 0 : i32
    %c0_i32_0 = arith.constant 0 : i32
    %c0_i32_1 = arith.constant 0 : i32
    return %c0_i32, %c0_i32_0 : i32, i32
  }
  func.func @transform_8(%arg0: i32) -> (i32, i32) {
    %c0_i32 = arith.constant 0 : i32
    %c0_i32_0 = arith.constant 0 : i32
    %c0_i32_1 = arith.constant 0 : i32
    return %c0_i32, %c0_i32_0 : i32, i32
  }
}

</mosaic_0001>

<bundles_post_ra>
// kernel: tpu_custom_call.1
= control target key start
LH: loop header
LB: loop body
LE: loop exit
PB: predicated region body
PF: predicated region fallthrough
CT: control target
= control target key end

     0   :  { %13 = vsyncpa [#allocation3], 0  ;;  %s1434_s0 = inlined_call_operand.vmem [shape: bf16[8,512], index: 0, kind: input, shape index: {}]   ;;  %s1435_s1 = inlined_call_operand.vmem [shape: bf16[2,8], index: 1, kind: input, shape index: {}]   ;;  %s1436_s2 = inlined_call_operand.vmem [shape: f32[2,1], index: 2, kind: input, shape index: {}]   ;;  %s1437_s3 = inlined_call_operand.vmem [shape: bf16[2,18], index: 3, kind: input, shape index: {}]   ;;  %s1438_s4 = inlined_call_operand.vmem [shape: f32[2,1], index: 4, kind: input, shape index: {}]   ;;  %s1439_s5 = inlined_call_operand.vmem [shape: bf16[8,2], index: 5, kind: input, shape index: {}]   ;;  %s1440_s6 = inlined_call_operand.vmem [shape: f32[8,1], index: 6, kind: input, shape index: {}]   ;;  %s1441_s7 = inlined_call_operand.hbm [shape: f32[9,512], index: 7, kind: input, shape index: {}]   ;;  %s1442_s8 = inlined_call_operand.hbm [shape: bf16[8,512], index: 8, kind: output, shape index: {}]  }
   0x1   :  { %14 = vsyncpa [#allocation4], 0  ;;  %s949_s27 = smov [#allocation2]   ;;  %s901_s9 = scalar_lea.hbm %s1441_s7, 1024 }
   0x2   :  { %s34_s28 = sshll.u32 %s949_s27, 4  ;;  %p902_p0 = scmp.ne.s32.totalorder %s1441_s7, %s901_s9  ;;  %s35_s28 = int_to_ptr.vmem [resolvable:$true] %s34_s28 }
   0x3   :  { %p905_p1 = scmp.lt.u32.totalorder %s901_s9, %s1441_s7 }
   0x5   :  { %p907_p2 = pnand %p905_p1, %p902_p0 }
   0x7   :  { %910 = shalt.err (!%p907_p2)
}
   0x8   :  { %s911_s14 = scalar_lea.vmem %s35_s28, 1024  ;;  %p916_p4 = scmp.lt.s32.totalorder %s35_s28, %s35_s28 }
   0x9   :  { %p912_p3 = scmp.ne.s32.totalorder %s35_s28, %s911_s14  ;;  %p917_p5 = scmp.lt.s32.totalorder %s911_s14, %s911_s14 }
   0xb   :  { %p918_p6 = por %p917_p5, %p916_p4 }
   0xd   :  { %p919_p7 = pnand %p918_p6, %p912_p3 }
   0xf   :  { %922 = shalt.err (!%p919_p7)
}
  0x10   :  { %s950_s15 = smov 512   ;;  %s951_s16 = smov 32  }
  0x11   :  { %40 = dma.hbm_to_vmem [thread:$0]  %s1441_s7, 1024, %s35_s28, [#allocation3], %s950_s15, %s950_s15, %s951_s16  }
  0x12   :  { %945 = dma.done.wait [#allocation3], 1024  }
  0x13   :  { %946 = vsyncadd [#allocation3], 4294966272  ;;  %v1443_v0 = vmov 0   ;;  %v1026_v1 = vld [vmem:[%s1434_s0] sm:$0xff]  ;;  %vm68_vm0 = vcmask 1043456   ;;  %v1031_v2 = vld [vmem:[%s1434_s0 + $0x8] sm:$0xff]  ;;  %v175_v36 = vlaneseq }
  0x14   :  { %113 = vmatprep.mubr.bf16.mxu0 %v1443_v0  ;;  %154 = vmatprep.mubr.bf16.mxu1 %v1443_v0  ;;  %v863_v3 = vcombine.high %v1026_v1, %v1026_v1  ;;  %v865_v4 = vcombine.high %v1031_v2, %v1031_v2  ;;  %v862_v5 = vcombine.low %v1026_v1, %v1026_v1  ;;  %v48_v7 = vld [vmem:[%s1436_s2] sm:$0x3]  ;;  %vm64_vm1 = vcmask 64512   ;;  %s954_s2 = smov 127   ;;  %s955_s25 = smov 15  }
  0x15   :  { %895 = vset.pattern.permute.xlu0 %v1443_v0  ;;  %896 = vset.pattern.permute.xlu1 %v1443_v0  ;;  %v864_v6 = vcombine.low %v1031_v2, %v1031_v2  ;;  %v47_v10 = vld [vmem:[%s1435_s1] sm:$0x1]  ;;  %s953_s1 = smov 16   ;;  %s956_s26 = smov 113   ;;  %v185_v39 = vshrl.u32 %v175_v36, 7  ;;  %v1117_v42 = vand.u32 127, %v175_v36 }
  0x16   :  { %51 = vperm.xlu0 %895, %v48_v7   ;;  %866 = vmatprep.subr.msk.bf16.mxu0 %vm68_vm0, %v863_v3  ;;  %v70_v8 = vsel %vm68_vm0, %v862_v5, 0  ;;  %s957_s27 = smov 17   ;;  %s958_s28 = smov 1   ;;  %v709_v28 = vld [vmem:[%s1440_s6] sm:$0xff]  ;;  %vm560_vm6 = vcmask 1041408   ;;  %vm569_vm10 = vcmask 1045504  }
  0x17   :  { %868 = vmatprep.subr.msk.bf16.mxu1 %vm68_vm0, %v865_v4  ;;  %v76_v9 = vsel %vm68_vm0, %v864_v6, 0  ;;  %82 = vmatpush1.bf16.msra.mxu0 %v70_v8  ;;  %s959_s29 = smov 112   ;;  %s960_s30 = smov 111   ;;  %v595_v29 = vld [vmem:[%s1438_s4] sm:$0x3]  ;;  %v1119_v43 = vsub.s32 0, %v185_v39 }
  0x18   :  { %123 = vmatpush1.bf16.msra.mxu1 %v76_v9  ;;  %v1121_v44 = vsub.s32 3, %v185_v39  ;;  %v1127_v47 = vld [vmem:[#allocation2 + $0x1] ss:$8 sm:$0xf]  ;;  %v1129_v48 = vsub.s32 1, %v185_v39  ;;  %v1131_v49 = vsub.s32 2, %v185_v39 }
  0x19   :  { %v342_v50 = vld [vmem:[#allocation2 + $0x5] ss:$8 sm:$0xf]  ;;  %v1133_v51 = vld [vmem:[#allocation2 + $0x2] ss:$8 sm:$0xf]  ;;  %v227_v52 = vrot.slane %v1127_v47, %v1119_v43 }
  0x1a   :  { %867 = vmatmul.mubr.msk.bf16.vlgmr.msra.gmra.mrb[0].mxu0 %vm64_vm1, %v47_v10  ;;  %vm216_vm2 = vcmp.lt.s32.totalorder %v1117_v42, 16  ;;  %v239_v53 = vrot.slane %v1127_v47, %v1121_v44  ;;  %v1140_v55 = vld [vmem:[#allocation2 + $0x6] ss:$8 sm:$0xf]  ;;  %vm336_vm3 = vcmp.lt.s32.totalorder %v1117_v42, 127  ;;  %v347_v57 = vrot.slane %v342_v50, %v1119_v43 }
  0x1b   :  { %869 = vmatmul.mubr.msk.bf16.vlgmr.msra.gmra.mrb[0].mxu1 %vm64_vm1, %v47_v10  ;;  %650 = vmatprep.mubr.bf16.mxu0 %v1443_v0  ;;  %v351_v58 = vrot.slane %v342_v50, %v1129_v48  ;;  %v355_v59 = vrot.slane %v342_v50, %v1131_v49  ;;  %v1146_v60 = vld [vmem:[#allocation2] ss:$8 sm:$0xf]  ;;  %v359_v61 = vrot.slane %v342_v50, %v1121_v44  ;;  %vm256_vm4 = vcmp.lt.s32.totalorder %v1117_v42, 15 }
  0x1c   :  { %691 = vmatprep.mubr.bf16.mxu1 %v1443_v0  ;;  %v271_v62 = vrot.slane %v1133_v51, %v1129_v48  ;;  %v275_v63 = vrot.slane %v1133_v51, %v1131_v49  ;;  %v267_v3 = vrot.slane %v1133_v51, %v1119_v43  ;;  %v279_v4 = vrot.slane %v1133_v51, %v1121_v44  ;;  %v1161_v6 = vld [vmem:[#allocation2 + $0x3] ss:$8 sm:$0xf] }
  0x1d   :  { %vm376_vm5 = vcmp.lt.s32.totalorder %v1117_v42, 113  ;;  %v387_v5 = vrot.slane %v1140_v55, %v1119_v43  ;;  %v391_v7 = vrot.slane %v1140_v55, %v1129_v48  ;;  %v395_v9 = vrot.slane %v1140_v55, %v1131_v49 }
  0x1e   :  { %v399_v10 = vrot.slane %v1140_v55, %v1121_v44  ;;  %vm177_vm7 = vcmp.lt.s32.totalorder %v1117_v42, 17  ;;  %vm296_vm8 = vcmp.lt.s32.totalorder %v1117_v42, 1  ;;  %vm416_vm9 = vcmp.lt.s32.totalorder %v1117_v42, 112 }
  0x1f   :  { %vm456_vm11 = vcmp.lt.s32.totalorder %v1117_v42, 111  ;;  %vm605_vm12 = vcmask 1040384   ;;  %vm601_vm13 = vcmask 146432   ;;  %vm715_vm14 = vcmask 15360  }
  0x95   :  { %v52_v11 = vpop.permute.xlu0 %51 }
  0xed   :  { %v115_v12 = vpop.f32.mrb[0].mxu0 }
  0xee   :  { %v156_v13 = vpop.f32.mrb[0].mxu1  ;;  %v116_v14 = vadd.f32 %v115_v12, %v52_v11  ;;  %v117_v16 = vpop.f32.mrb[1].mxu0  ;;  %v191_v12 = vrot.slane %v1146_v60, %v1129_v48 }
  0xef   :  { %v157_v15 = vadd.f32 %v156_v13, %v52_v11  ;;  %v158_v17 = vpop.f32.mrb[1].mxu1  ;;  %v119_v18 = vpop.f32.mrb[2].mxu0  ;;  %v118_v25 = vadd.f32 %v117_v16, %v52_v11  ;;  %v199_v16 = vrot.slane %v1146_v60, %v1121_v44 }
  0xf0   :  { %v160_v19 = vpop.f32.mrb[2].mxu1  ;;  %v1053_v20 = vmax.f32 %v116_v14, 0.0  ;;  %v159_v22 = vadd.f32 %v158_v17, %v52_v11  ;;  %v120_v23 = vpop.f32.mrb[3].mxu0  ;;  %v195_v14 = vrot.slane %v1146_v60, %v1131_v49  ;;  %v1182_v17 = vld [vmem:[#allocation2 + $0x7] ss:$8 sm:$0xf] }
  0xf1   :  { %v1055_v21 = vmax.f32 %v157_v15, 0.0  ;;  %v161_v24 = vpop.f32.mrb[3].mxu1  ;;  %v1066_v27 = vmax.f32 %v118_v25, 0.0  ;;  %v187_v15 = vrot.slane %v1146_v60, %v1119_v43 }
  0xf2   :  { %208 = vrot.lane.b32.xlu0 %v1053_v20, %s953_s1  ;;  %v1061_v26 = vmax.f32 %v159_v22, 0.0  ;;  %v307_v24 = vrot.slane %v1161_v6, %v1119_v43 }
  0xf3   :  { %212 = vrot.lane.b32.xlu1 %v1055_v21, %s953_s1 }
  0xf6   :  { %214 = vrot.lane.b32.xlu0 %v1061_v26, %s953_s1 }
  0xf7   :  { %328 = vrot.lane.b32.xlu1 %v1053_v20, %s954_s2 }
  0xfa   :  { %330 = vrot.lane.b32.xlu0 %v1066_v27, %s954_s2 }
  0xfb   :  { %332 = vrot.lane.b32.xlu1 %v1055_v21, %s954_s2 }
  0xfe   :  { %334 = vrot.lane.b32.xlu0 %v1061_v26, %s954_s2 }
  0xff   :  { %248 = vrot.lane.b32.xlu1 %v1053_v20, %s955_s25 }
 0x102   :  { %250 = vrot.lane.b32.xlu0 %v1066_v27, %s955_s25 }
 0x103   :  { %252 = vrot.lane.b32.xlu1 %v1055_v21, %s955_s25 }
 0x106   :  { %254 = vrot.lane.b32.xlu0 %v1061_v26, %s955_s25 }
 0x107   :  { %368 = vrot.lane.b32.xlu1 %v1053_v20, %s956_s26 }
 0x10a   :  { %370 = vrot.lane.b32.xlu0 %v1066_v27, %s956_s26 }
 0x10b   :  { %372 = vrot.lane.b32.xlu1 %v1055_v21, %s956_s26 }
 0x10e   :  { %374 = vrot.lane.b32.xlu0 %v1061_v26, %s956_s26 }
 0x10f   :  { %167 = vrot.lane.b32.xlu1 %v1053_v20, %s957_s27 }
 0x112   :  { %169 = vrot.lane.b32.xlu0 %v1066_v27, %s957_s27 }
 0x113   :  { %171 = vrot.lane.b32.xlu1 %v1055_v21, %s957_s27 }
 0x116   :  { %173 = vrot.lane.b32.xlu0 %v1061_v26, %s957_s27 }
 0x117   :  { %288 = vrot.lane.b32.xlu1 %v1053_v20, %s958_s28 }
 0x11a   :  { %290 = vrot.lane.b32.xlu0 %v1066_v27, %s958_s28 }
 0x11b   :  { %292 = vrot.lane.b32.xlu1 %v1055_v21, %s958_s28 }
 0x11e   :  { %294 = vrot.lane.b32.xlu0 %v1061_v26, %s958_s28 }
 0x11f   :  { %408 = vrot.lane.b32.xlu1 %v1053_v20, %s959_s29 }
 0x122   :  { %410 = vrot.lane.b32.xlu0 %v1066_v27, %s959_s29 }
 0x123   :  { %210 = vrot.lane.b32.xlu1 %v1066_v27, %s953_s1 }
 0x126   :  { %414 = vrot.lane.b32.xlu0 %v1061_v26, %s959_s29 }
 0x127   :  { %412 = vrot.lane.b32.xlu1 %v1055_v21, %s959_s29 }
 0x12a   :  { %450 = vrot.lane.b32.xlu0 %v1066_v27, %s960_s30 }
 0x12b   :  { %448 = vrot.lane.b32.xlu1 %v1053_v20, %s960_s30 }
 0x12e   :  { %454 = vrot.lane.b32.xlu0 %v1061_v26, %s960_s30 }
 0x12f   :  { %452 = vrot.lane.b32.xlu1 %v1055_v21, %s960_s30 }
 0x132   :  { %712 = vperm.xlu0 %895, %v709_v28  }
 0x133   :  { %598 = vperm.xlu1 %896, %v595_v29  }
 0x164   :  { %v1105_v31 = vpop.permute.xlu0 %208 }
 0x165   :  { %v1103_v30 = vpop.permute.xlu1 %212 }
 0x168   :  { %v1109_v33 = vpop.permute.xlu0 %214 }
 0x169   :  { %v1107_v32 = vpop.permute.xlu1 %328  ;;  %v217_v22 = vsel %vm216_vm2, %v1103_v30, %v1109_v33 }
 0x16c   :  { %v331_v35 = vpop.permute.xlu0 %330 }
 0x16d   :  { %v333_v34 = vpop.permute.xlu1 %332  ;;  %v339_v13 = vsel %vm336_vm3, %v1107_v32, %v331_v35 }
 0x16e   :  { %v338_v18 = vsel %vm336_vm3, %v331_v35, %v333_v34  ;;  %v1200_v35 = vld [vmem:[#allocation2 + $0x20] ss:$8 sm:$0xf] }
 0x16f   :  { %v471_v29 = vrot.slane %v1200_v35, %v1129_v48 }
 0x170   :  { %v335_v38 = vpop.permute.xlu0 %334 }
 0x171   :  { %v1111_v37 = vpop.permute.xlu1 %248  ;;  %v337_v19 = vsel %vm336_vm3, %v333_v34, %v335_v38  ;;  %v364_v34 = vmul.f32 %v347_v57, %v339_v13  ;;  %v340_v36 = vsel %vm336_vm3, %v335_v38, %v1107_v32  ;;  %v220_v32 = vsel %vm216_vm2, %v1109_v33, %v1105_v31 }
 0x172   :  { %v365_v38 = vmul.f32 %v351_v58, %v338_v18  ;;  %v366_v57 = vmul.f32 %v355_v59, %v337_v19  ;;  %v367_v28 = vmul.f32 %v359_v61, %v340_v36  ;;  %v244_v59 = vmul.f32 %v227_v52, %v220_v32 }
 0x173   :  { %v247_v18 = vmul.f32 %v239_v53, %v217_v22  ;;  %v528_v19 = vrot.slane %v364_v34, 6 }
 0x174   :  { %v1115_v41 = vpop.permute.xlu0 %250  ;;  %v529_v61 = vrot.slane %v365_v38, 6  ;;  %v530_v36 = vrot.slane %v366_v57, 6  ;;  %v531_v34 = vrot.slane %v367_v28, 6  ;;  %v492_v57 = vrot.slane %v244_v59, 6 }
 0x175   :  { %v1113_v40 = vpop.permute.xlu1 %252  ;;  %v495_v58 = vrot.slane %v247_v18, 6 }
 0x176   :  { %v258_v52 = vsel %vm256_vm4, %v1115_v41, %v1113_v40  ;;  %v577_v28 = vsel %vm560_vm6, %v1061_v26, %v531_v34  ;;  %v1445_v34 = vrot.slane %v1161_v6, %v1121_v44 }
 0x178   :  { %v1125_v46 = vpop.permute.xlu0 %254 }
 0x179   :  { %v1123_v45 = vpop.permute.xlu1 %368  ;;  %v260_v53 = vsel %vm256_vm4, %v1125_v46, %v1111_v37  ;;  %v257_v32 = vsel %vm256_vm4, %v1113_v40, %v1125_v46  ;;  %v1268_v40 = vmul.f32 %v275_v63, %v258_v52 }
 0x17c   :  { %v371_v56 = vpop.permute.xlu0 %370 }
 0x17d   :  { %v373_v54 = vpop.permute.xlu1 %372  ;;  %v379_v33 = vsel %vm376_vm5, %v1123_v45, %v371_v56 }
 0x17e   :  { %v378_v25 = vsel %vm376_vm5, %v371_v56, %v373_v54  ;;  %v259_v56 = vsel %vm256_vm4, %v1111_v37, %v1115_v41  ;;  %v574_v37 = vsel %vm560_vm6, %v1053_v20, %v528_v19 }
 0x17f   :  { %v405_v22 = vmul.f32 %v391_v7, %v378_v25 }
 0x180   :  { %v375_v11 = vpop.permute.xlu0 %374 }
 0x181   :  { %v1165_v8 = vpop.permute.xlu1 %167  ;;  %v377_v23 = vsel %vm376_vm5, %v373_v54, %v375_v11  ;;  %v404_v54 = vmul.f32 %v387_v5, %v379_v33  ;;  %v380_v38 = vsel %vm376_vm5, %v375_v11, %v1123_v45  ;;  %v1263_v5 = vmul.f32 %v271_v62, %v259_v56 }
 0x182   :  { %v406_v41 = vmul.f32 %v395_v9, %v377_v23  ;;  %v284_v45 = vmul.f32 %v267_v3, %v260_v53  ;;  %v287_v62 = vmul.f32 %v279_v4, %v257_v32  ;;  %v541_v11 = vrot.slane %v405_v22, 4 }
 0x183   :  { %v540_v9 = vrot.slane %v404_v54, 4  ;;  %v407_v63 = vmul.f32 %v399_v10, %v380_v38  ;;  %v575_v3 = vsel %vm560_vm6, %v1066_v27, %v529_v61  ;;  %v576_v23 = vsel %vm560_vm6, %v1055_v21, %v530_v36 }
 0x184   :  { %v170_v50 = vpop.permute.xlu0 %169  ;;  %v505_v26 = vrot.slane %v1263_v5, 4  ;;  %v506_v33 = vrot.slane %v1268_v40, 4  ;;  %v504_v59 = vrot.slane %v284_v45, 4  ;;  %v1446_v32 = vrot.slane %v1127_v47, %v1129_v48 }
 0x185   :  { %v172_v39 = vpop.permute.xlu1 %171  ;;  %v180_v4 = vsel %vm177_vm7, %v1165_v8, %v170_v50  ;;  %v543_v18 = vrot.slane %v407_v63, 4  ;;  %v1449_v5 = vrot.slane %v1161_v6, %v1129_v48  ;;  %v1450_v45 = vrot.slane %v1161_v6, %v1131_v49 }
 0x186   :  { %v179_v51 = vsel %vm177_vm7, %v170_v50, %v172_v39  ;;  %v578_v50 = vsel %vm68_vm0, %v574_v37, %v540_v9  ;;  %v205_v19 = vmul.f32 %v191_v12, %v180_v4  ;;  %v1451_v4 = vrot.slane %v1182_v17, %v1129_v48 }
 0x187   :  { %v206_v61 = vmul.f32 %v195_v14, %v179_v51  ;;  %v581_v40 = vsel %vm68_vm0, %v577_v28, %v543_v18 }
 0x188   :  { %v174_v13 = vpop.permute.xlu0 %173 }
 0x189   :  { %v289_v0 = vpop.permute.xlu1 %288  ;;  %v178_v46 = vsel %vm177_vm7, %v172_v39, %v174_v13  ;;  %v181_v20 = vsel %vm177_vm7, %v174_v13, %v1165_v8  ;;  %v542_v13 = vrot.slane %v406_v41, 4  ;;  %v507_v8 = vrot.slane %v287_v62, 4 }
 0x18a   :  { %v204_v55 = vmul.f32 %v187_v15, %v181_v20  ;;  %v207_v27 = vmul.f32 %v199_v16, %v178_v46  ;;  %v579_v15 = vsel %vm68_vm0, %v575_v3, %v541_v11  ;;  %v1447_v41 = vrot.slane %v1127_v47, %v1131_v49 }
 0x18b   :  { %v580_v16 = vsel %vm68_vm0, %v576_v23, %v542_v13 }
 0x18c   :  { %v291_v25 = vpop.permute.xlu0 %290  ;;  %v561_v56 = vsel %vm560_vm6, %v204_v55, %v492_v57  ;;  %v564_v52 = vsel %vm560_vm6, %v207_v27, %v495_v58 }
 0x18d   :  { %v293_v7 = vpop.permute.xlu1 %292  ;;  %v299_v53 = vsel %vm296_vm8, %v289_v0, %v291_v25 }
 0x18e   :  { %v298_v60 = vsel %vm296_vm8, %v291_v25, %v293_v7  ;;  %v568_v25 = vsel %vm68_vm0, %v564_v52, %v507_v8 }
 0x18f   :  { %v326_v46 = vmul.f32 %v1450_v45, %v298_v60 }
 0x190   :  { %v295_v10 = vpop.permute.xlu0 %294 }
 0x191   :  { %v409_v21 = vpop.permute.xlu1 %408  ;;  %v300_v39 = vsel %vm296_vm8, %v295_v10, %v289_v0  ;;  %v297_v36 = vsel %vm296_vm8, %v293_v7, %v295_v10  ;;  %v325_v7 = vmul.f32 %v1449_v5, %v299_v53  ;;  %v1452_v10 = vrot.slane %v1182_v17, %v1131_v49 }
 0x192   :  { %v324_v54 = vmul.f32 %v307_v24, %v300_v39  ;;  %v327_v24 = vmul.f32 %v1445_v34, %v297_v36  ;;  %v1453_v39 = vrot.slane %v1182_v17, %v1121_v44  ;;  %v518_v18 = vrot.slane %v326_v46, 2 }
 0x193   :  { %v517_v27 = vrot.slane %v325_v7, 2  ;;  %v1456_v7 = vrot.slane %v1200_v35, %v1121_v44  ;;  %v594_v44 = vld [vmem:[%s1437_s3] sm:$0x1] }
 0x194   :  { %v411_v12 = vpop.permute.xlu0 %410  ;;  %v516_v47 = vrot.slane %v324_v54, 2  ;;  %v519_v28 = vrot.slane %v327_v24, 2 }
 0x195   :  { %v211_v22 = vpop.permute.xlu1 %210  ;;  %v419_v0 = vsel %vm416_vm9, %v409_v21, %v411_v12 }
 0x196   :  { %v218_v14 = vsel %vm216_vm2, %v211_v22, %v1103_v30  ;;  %v219_v58 = vsel %vm216_vm2, %v1105_v31, %v211_v22  ;;  %v1448_v30 = vrot.slane %v1182_v17, %v1119_v43  ;;  %v565_v31 = vsel %vm68_vm0, %v561_v56, %v504_v59 }
 0x197   :  { %v245_v38 = vmul.f32 %v1446_v32, %v219_v58  ;;  %v246_v57 = vmul.f32 %v1447_v41, %v218_v14  ;;  %v1454_v17 = vrot.slane %v1200_v35, %v1119_v43 }
 0x198   :  { %v444_v37 = vmul.f32 %v1448_v30, %v419_v0  ;;  %v415_v11 = vpop.permute.xlu0 %414 }
 0x199   :  { %v493_v20 = vrot.slane %v245_v38, 6  ;;  %v494_v62 = vrot.slane %v246_v57, 6  ;;  %v413_v9 = vpop.permute.xlu1 %412  ;;  %v420_v13 = vsel %vm416_vm9, %v415_v11, %v409_v21 }
 0x19a   :  { %v552_v63 = vrot.slane %v444_v37, 2  ;;  %v418_v3 = vsel %vm416_vm9, %v411_v12, %v413_v9  ;;  %v417_v23 = vsel %vm416_vm9, %v413_v9, %v415_v11  ;;  %v447_v8 = vmul.f32 %v1453_v39, %v420_v13 }
 0x19b   :  { %v562_v51 = vsel %vm560_vm6, %v205_v19, %v493_v20  ;;  %v563_v6 = vsel %vm560_vm6, %v206_v61, %v494_v62  ;;  %v445_v55 = vmul.f32 %v1451_v4, %v418_v3  ;;  %v446_v59 = vmul.f32 %v1452_v10, %v417_v23 }
 0x19c   :  { %v566_v21 = vsel %vm68_vm0, %v562_v51, %v505_v26  ;;  %v570_v19 = vsel %vm569_vm10, %v565_v31, %v516_v47  ;;  %v567_v61 = vsel %vm68_vm0, %v563_v6, %v506_v33  ;;  %v451_v52 = vpop.permute.xlu0 %450  ;;  %v582_v53 = vsel %vm569_vm10, %v578_v50, %v552_v63 }
 0x19d   :  { %v553_v36 = vrot.slane %v445_v55, 2  ;;  %v449_v56 = vpop.permute.xlu1 %448  ;;  %v554_v54 = vrot.slane %v446_v59, 2  ;;  %v555_v22 = vrot.slane %v447_v8, 2  ;;  %v571_v26 = vsel %vm569_vm10, %v566_v21, %v517_v27 }
 0x19e   :  { %v459_v12 = vsel %vm456_vm11, %v449_v56, %v451_v52  ;;  %v573_v33 = vsel %vm569_vm10, %v568_v25, %v519_v28  ;;  %v572_v34 = vsel %vm569_vm10, %v567_v61, %v518_v18  ;;  %v586_v41 = vpack.c.bf16 %v582_v53, %v570_v19  ;;  %v704_v19 = vld [vmem:[%s1439_s5] sm:$0xf]  ;;  %s961_s5 = smov [#allocation5]  }
 0x19f   :  { %v484_v60 = vmul.f32 %v1454_v17, %v459_v12  ;;  %v583_v14 = vsel %vm569_vm10, %v579_v15, %v553_v36  ;;  %v584_v58 = vsel %vm569_vm10, %v580_v16, %v554_v54  ;;  %v585_v50 = vsel %vm569_vm10, %v581_v40, %v555_v22  ;;  %s853_s14 = sshll.u32 %s961_s5, 4  ;;  %s854_s14 = int_to_ptr.vmem [resolvable:$true] %s853_s14 }
 0x1a0   :  { %v587_v0 = vpack.c.bf16 %v583_v14, %v571_v26  ;;  %v455_v32 = vpop.permute.xlu0 %454  ;;  %v589_v38 = vpack.c.bf16 %v585_v50, %v573_v33  ;;  %v588_v57 = vpack.c.bf16 %v584_v58, %v572_v34  ;;  %v1455_v31 = vrot.slane %v1200_v35, %v1131_v49  ;;  %s923_s15 = scalar_lea.vmem %s854_s14, 256  ;;  %p928_p9 = scmp.lt.s32.totalorder %s854_s14, %s854_s14 }
 0x1a1   :  { %v453_v24 = vpop.permute.xlu1 %452  ;;  %v590_v43 = vpack.c.bf16 %v484_v60, %v484_v60  ;;  %v460_v16 = vsel %vm456_vm11, %v455_v32, %v449_v56  ;;  %v817_v53 = vunpack.c.l.bf16 %v1026_v1  ;;  %v819_v22 = vunpack.c.l.bf16 %v1031_v2  ;;  %p924_p8 = scmp.ne.s32.totalorder %s854_s14, %s923_s15  ;;  %p929_p10 = scmp.lt.s32.totalorder %s923_s15, %s923_s15 }
 0x1a2   :  { %v458_v30 = vsel %vm456_vm11, %v451_v52, %v453_v24  ;;  %v457_v15 = vsel %vm456_vm11, %v453_v24, %v455_v32  ;;  %618 = vmatprep.subr.bf16.mxu0 %v587_v0  ;;  %v487_v25 = vmul.f32 %v1456_v7, %v460_v16  ;;  %659 = vmatprep.subr.bf16.mxu1 %v589_v38  ;;  %v818_v26 = vunpack.c.h.bf16 %v1026_v1 }
 0x1a3   :  { %v485_v37 = vmul.f32 %v471_v29, %v458_v30  ;;  %v486_v5 = vmul.f32 %v1455_v31, %v457_v15  ;;  %619 = vmatpush1.bf16.msra.mxu0 %v586_v41  ;;  %660 = vmatpush1.bf16.msra.mxu1 %v588_v57  ;;  %v607_v48 = vsel %vm605_vm12, %v590_v43, 0  ;;  %v1457_v29 = vmov 0   ;;  %p930_p11 = por %p929_p10, %p928_p9 }
 0x1a4   :  { %v593_v45 = vpack.c.bf16 %v487_v25, %v487_v25  ;;  %v820_v33 = vunpack.c.h.bf16 %v1031_v2 }
 0x1a5   :  { %v591_v40 = vpack.c.bf16 %v485_v37, %v485_v37  ;;  %v592_v42 = vpack.c.bf16 %v486_v5, %v486_v5  ;;  %p931_p12 = pnand %p930_p11, %p924_p8 }
 0x1a6   :  { %872 = vmatprep.subr.msk.bf16.mxu1 %vm605_vm12, %v593_v45 }
 0x1a7   :  { %870 = vmatprep.subr.msk.bf16.mxu0 %vm605_vm12, %v591_v40  ;;  %v613_v49 = vsel %vm605_vm12, %v592_v42, 0 }
 0x1a8   :  { %621 = vmatpush1.bf16.msra.mxu0 %v607_v48  ;;  %662 = vmatpush1.bf16.msra.mxu1 %v613_v49 }
 0x1ab   :  { %871 = vmatmul.mubr.msk.bf16.vlgmr.msra.gmra.mrb[4].mxu0 %vm601_vm13, %v594_v44  ;;  %873 = vmatmul.mubr.msk.bf16.vlgmr.msra.gmra.mrb[4].mxu1 %vm601_vm13, %v594_v44 }
 0x1ac   :  { %763 = vmatprep.mubr.bf16.mxu0 %v1457_v29  ;;  %804 = vmatprep.mubr.bf16.mxu1 %v1457_v29 }
 0x1b1   :  { %v713_v61 = vpop.permute.xlu0 %712 }
 0x1b2   :  { %v599_v35 = vpop.permute.xlu1 %598 }
 0x27e   :  { %v652_v46 = vpop.f32.mrb[4].mxu0  ;;  %v693_v47 = vpop.f32.mrb[4].mxu1 }
 0x27f   :  { %v653_v20 = vadd.f32 %v652_v46, %v599_v35  ;;  %v694_v62 = vadd.f32 %v693_v47, %v599_v35  ;;  %v654_v9 = vpop.f32.mrb[5].mxu0  ;;  %v695_v11 = vpop.f32.mrb[5].mxu1 }
 0x280   :  { %v655_v63 = vadd.f32 %v654_v9, %v599_v35  ;;  %v696_v3 = vadd.f32 %v695_v11, %v599_v35  ;;  %v656_v23 = vpop.f32.mrb[6].mxu0  ;;  %v697_v13 = vpop.f32.mrb[6].mxu1 }
 0x281   :  { %v700_v28 = vmax.f32 %v653_v20, 0.0  ;;  %v702_v51 = vmax.f32 %v694_v62, 0.0  ;;  %v657_v6 = vpop.f32.mrb[7].mxu0  ;;  %v698_v4 = vpop.f32.mrb[7].mxu1 }
 0x282   :  { %v701_v55 = vmax.f32 %v655_v63, 0.0  ;;  %v703_v27 = vmax.f32 %v696_v3, 0.0 }
 0x283   :  { %v705_v10 = vpack.c.bf16 %v700_v28, %v700_v28  ;;  %v707_v59 = vpack.c.bf16 %v702_v51, %v702_v51 }
 0x284   :  { %v706_v39 = vpack.c.bf16 %v701_v55, %v701_v55  ;;  %v708_v8 = vpack.c.bf16 %v703_v27, %v703_v27 }
 0x285   :  { %v720_v21 = vsel %vm605_vm12, %v705_v10, 0  ;;  %v726_v18 = vsel %vm605_vm12, %v707_v59, 0 }
 0x286   :  { %874 = vmatprep.subr.msk.bf16.mxu0 %vm605_vm12, %v706_v39  ;;  %876 = vmatprep.subr.msk.bf16.mxu1 %vm605_vm12, %v708_v8 }
 0x287   :  { %732 = vmatpush1.bf16.msra.mxu0 %v720_v21  ;;  %773 = vmatpush1.bf16.msra.mxu1 %v726_v18 }
 0x28a   :  { %875 = vmatmul.mubr.msk.bf16.vlgmr.msra.gmra.mrb[8].mxu0 %vm715_vm14, %v704_v19  ;;  %877 = vmatmul.mubr.msk.bf16.vlgmr.msra.gmra.mrb[8].mxu1 %vm715_vm14, %v704_v19 }
 0x35d   :  { %v765_v36 = vpop.f32.mrb[8].mxu0  ;;  %v806_v56 = vpop.f32.mrb[8].mxu1 }
 0x35e   :  { %v766_v52 = vadd.f32 %v765_v36, %v713_v61  ;;  %v807_v54 = vadd.f32 %v806_v56, %v713_v61  ;;  %v767_v12 = vpop.f32.mrb[9].mxu0  ;;  %v808_v17 = vpop.f32.mrb[9].mxu1 }
 0x35f   :  { %v768_v60 = vadd.f32 %v767_v12, %v713_v61  ;;  %v809_v14 = vadd.f32 %v808_v17, %v713_v61  ;;  %v769_v58 = vpop.f32.mrb[10].mxu0  ;;  %v810_v0 = vpop.f32.mrb[10].mxu1 }
 0x360   :  { %v813_v50 = vmax.f32 %v766_v52, 0.0  ;;  %v815_v34 = vmax.f32 %v807_v54, 0.0  ;;  %v770_v24 = vpop.f32.mrb[11].mxu0  ;;  %v811_v32 = vpop.f32.mrb[11].mxu1 }
 0x361   :  { %v814_v38 = vmax.f32 %v768_v60, 0.0  ;;  %v816_v41 = vmax.f32 %v809_v14, 0.0 }
 0x362   :  { %v821_v57 = vadd.f32 %v817_v53, %v813_v50  ;;  %v823_v43 = vadd.f32 %v819_v22, %v815_v34 }
 0x363   :  { %v822_v30 = vadd.f32 %v818_v26, %v814_v38  ;;  %v824_v15 = vadd.f32 %v820_v33, %v816_v41 }
 0x364   :  { %v825_v16 = vmax.f32 %v821_v57, 0.0  ;;  %v827_v37 = vmax.f32 %v823_v43, 0.0 }
 0x365   :  { %v826_v1 = vmax.f32 %v822_v30, 0.0  ;;  %v828_v31 = vmax.f32 %v824_v15, 0.0 }
 0x367   :  { %v880_v5 = vpack.c.bf16 %v826_v1, %v825_v16  ;;  %v881_v2 = vpack.c.bf16 %v828_v31, %v827_v37 }
 0x369   :  { %845 = vst [vmem:[#allocation5] sm:$0xff] %v880_v5  ;;  %846 = vst [vmem:[#allocation5 + $0x8] sm:$0xff] %v881_v2 }
 0x36a   :  { %934 = shalt.err (!%p931_p12)
}
 0x36b   :  { %s935_s18 = scalar_lea.hbm %s1442_s8, 256 }
 0x36c   :  { %p936_p13 = scmp.ne.s32.totalorder %s1442_s8, %s935_s18  ;;  %p939_p0 = scmp.lt.u32.totalorder %s935_s18, %s1442_s8 }
 0x36e   :  { %p941_p1 = pnand %p939_p0, %p936_p13 }
 0x370   :  { %944 = shalt.err (!%p941_p1)
}
 0x371   :  { %856 = dma.vmem_to_hbm [thread:$0]  %s854_s14, 256, %s1442_s8, [#allocation4]  }
 0x372   :  { %947 = dma.done.wait [#allocation4], 256  }
 0x373   :  { %948 = vsyncadd [#allocation4], 4294967040 }
 0x374   :  { %860 = vsyncpa [#allocation3], 1 }
 0x375   :  { %861 = vsyncpa [#allocation4], 1 }

</bundles_post_ra>
